<compile_context>
chip_gen: v5e
topology: v5e:2x2
jax: 0.10.0
libtpu: 0.0.40
codegen_flags: <defaults>
</compile_context>

<pallas_src>
import functools

import jax
import jax.numpy as jnp
from jax.experimental import pallas as pl
from jax.experimental.pallas import tpu as pltpu


def _vit_input_kernel(x_ref, w_ref, pos_ref, cls_ref, o_ref):
    # x_ref:   (TB, N, K)    unfolded patch pixels (matmul dtype)
    # w_ref:   (K, D)        conv weight reshaped + transposed (resident)
    # pos_ref: (N, D)  f32   pos_emb[1:] + conv bias folded in (resident)
    # cls_ref: (1, D)  f32   cls_token + pos_emb[0] (resident)
    # o_ref:   (TB, N+1, D)  full per-sample output slab (cls row + patch rows)
    tb = x_ref.shape[0]
    w = w_ref[...]
    pos = pos_ref[...]
    cls_row = cls_ref[...].astype(o_ref.dtype)            # (1, D)
    # Static unroll over the (small) per-step batch tile: one well-shaped MXU
    # matmul per sample, f32 epilogue add, then a sublane-offset store into the
    # (N+1, D) slab (masked store; VMEM-side, hidden under the block DMAs).
    for b in range(tb):
        acc = jnp.dot(x_ref[b], w, preferred_element_type=jnp.float32)  # (N, D)
        o_ref[b, 0:1, :] = cls_row
        o_ref[b, 1:, :] = (acc + pos).astype(o_ref.dtype)


def vit_input_layer(x_nchw, conv_w, conv_b, cls_token, pos_emb, num_patch_row,
                    *, matmul_dtype=jnp.bfloat16, out_dtype=None,
                    target_rows=2048):
    """x_nchw: (B, C, H, W) -> z_0: (B, N+1, D).  Matches VitInputLayer.forward."""
    B, C, H, W = x_nchw.shape
    D = conv_w.shape[0]
    P = conv_w.shape[2]
    nr = num_patch_row
    N = nr * nr
    K = C * P * P
    out_dtype = x_nchw.dtype if out_dtype is None else jnp.dtype(out_dtype)

    # --- unfold NCHW -> (B, N, K); cast first so the transpose writes bf16 ----
    # TODO(synk): the unfold is still one XLA transpose through HBM; expressing
    # it via BlockSpec needs a rank-6 in-VMEM transpose that Mosaic lowers
    # poorly, so it stays a (now half-width) XLA op.
    x_cast = x_nchw if matmul_dtype is None else x_nchw.astype(matmul_dtype)
    patches = x_cast.reshape(B, C, nr, P, nr, P)
    patches = jnp.transpose(patches, (0, 2, 4, 1, 3, 5)).reshape(B, N, K)

    w_t = conv_w.reshape(D, K).T                           # (K, D)
    if matmul_dtype is not None:
        w_t = w_t.astype(matmul_dtype)

    pos = pos_emb.reshape(N + 1, D).astype(jnp.float32)
    # Fold conv bias into the patch positional rows -> single f32 add in-kernel.
    pos_patch = pos[1:] + conv_b.reshape(1, D).astype(jnp.float32)     # (N, D)
    # cls row is input independent: computed once, stored by the kernel.
    cls_row = cls_token.reshape(1, D).astype(jnp.float32) + pos[:1]    # (1, D)

    # --- tile selection: TB whole samples per grid step -----------------------
    x_item = jnp.dtype(patches.dtype).itemsize
    w_item = jnp.dtype(w_t.dtype).itemsize
    o_item = jnp.dtype(out_dtype).itemsize

    def est_vmem(tb):
        return (2 * tb * N * K * x_item            # double-buffered X blocks
                + 2 * K * D * w_item               # resident weight (worst case 2x)
                + 2 * N * D * 4 + 2 * D * 4        # resident pos / cls tiles
                + 2 * tb * (N + 1) * D * o_item)   # double-buffered output blocks

    try:   # per-TensorCore VMEM capacity (v7x: 64 MiB) with headroom for Mosaic
        vmem_cap = int(pltpu.get_tpu_info().vmem_capacity_bytes)
    except Exception:
        vmem_cap = 64 << 20                         # conservative (v7x per-TC)
    budget = max(8 << 20, vmem_cap - (8 << 20))

    # ~target_rows patch rows per step amortizes the ~0.35us/step overhead;
    # cap the static unroll at 64 samples/step.
    TB = max(1, min(B, target_rows // max(N, 1), 64))
    while TB > 1 and est_vmem(TB) > budget:
        TB -= 1

    steps = int(pl.cdiv(B, TB))
    if steps > 1 and steps % 2 == 1:                # v7x megacore: prefer even steps
        cand = int(pl.cdiv(B, steps - 1))
        if cand <= 64 and est_vmem(cand) <= budget:
            TB = cand
        else:
            TB = int(pl.cdiv(B, steps + 1))
        steps = int(pl.cdiv(B, TB))

    est = est_vmem(TB)
    vmem_limit = None
    if est > (24 << 20):
        vmem_limit = int(min(est + (4 << 20), budget))

    # --- pallas_call: no pad, no trailing concat; ragged last block is masked -
    out = pl.pallas_call(
        _vit_input_kernel,
        out_shape=jax.ShapeDtypeStruct((B, N + 1, D), out_dtype),
        grid_spec=pltpu.PrefetchScalarGridSpec(
            num_scalar_prefetch=0,
            grid=(steps,),
            in_specs=[
                pl.BlockSpec((TB, N, K), lambda i: (i, 0, 0)),   # patch slabs
                pl.BlockSpec((K, D), lambda i: (0, 0)),          # weight^T (resident)
                pl.BlockSpec((N, D), lambda i: (0, 0)),          # pos+bias (resident)
                pl.BlockSpec((1, D), lambda i: (0, 0)),          # cls row (resident)
            ],
            out_specs=pl.BlockSpec((TB, N + 1, D), lambda i: (i, 0, 0)),
        ),
        compiler_params=pltpu.CompilerParams(
            dimension_semantics=("parallel",),
            vmem_limit_bytes=vmem_limit),
    )(patches, w_t, pos_patch, cls_row)
    return out


def _reference(x_nchw, conv_w, conv_b, cls_token, pos_emb, num_patch_row):
    """Pure-JAX reference replicating the PyTorch forward."""
    B, C, H, W = x_nchw.shape
    D, _, P, _ = conv_w.shape
    nr = num_patch_row
    N = nr * nr
    patches = x_nchw.reshape(B, C, nr, P, nr, P)
    patches = jnp.transpose(patches, (0, 2, 4, 1, 3, 5)).reshape(B, N, C * P * P)
    emb = jnp.einsum("bnk,dk->bnd", patches, conv_w.reshape(D, C * P * P)) + conv_b
    cls = jnp.broadcast_to(cls_token.reshape(1, 1, D), (B, 1, D))
    z0 = jnp.concatenate([cls, emb], axis=1) + pos_emb.reshape(1, N + 1, D)
    return z0


if __name__ == "__main__":
    # Small, deterministic configuration consistent with the module:
    # in_channels=4, emb_dim=128, num_patch_row=2, image_size=16.
    B, C, H = 2, 4, 16
    num_patch_row = 2
    emb_dim = 128
    patch_size = H // num_patch_row              # 8
    num_patch = num_patch_row ** 2               # 4

    key = jax.random.PRNGKey(0)
    kx, kw, kb, kc, kp = jax.random.split(key, 5)

    x = jax.random.normal(kx, (B, C, H, H), dtype=jnp.float32)
    conv_w = 0.02 * jax.random.normal(
        kw, (emb_dim, C, patch_size, patch_size), dtype=jnp.float32)
    conv_b = 0.1 * jax.random.normal(kb, (emb_dim,), dtype=jnp.float32)
    cls_token = jax.random.normal(kc, (1, 1, emb_dim), dtype=jnp.float32)
    pos_emb = jax.random.normal(kp, (1, num_patch + 1, emb_dim), dtype=jnp.float32)

    ref = _reference(x, conv_w, conv_b, cls_token, pos_emb, num_patch_row)

    # f32 matmul path.  Tolerance accounts for MXU default-precision differences
    # between the kernel matmul and the XLA reference einsum; real bugs (missing
    # bias/pos/cls, wrong patch order) produce errors >= 1e-1.
    fn_f32 = jax.jit(functools.partial(
        vit_input_layer, num_patch_row=num_patch_row, matmul_dtype=None))
    z0 = fn_f32(x, conv_w, conv_b, cls_token, pos_emb)
    jax.block_until_ready(z0)
    assert z0.shape == (B, num_patch + 1, emb_dim)
    assert jnp.allclose(z0, ref, atol=5e-3, rtol=5e-3)

    # bf16-input MXU path (recommended default on v5e/v6e/v7x); epilogue stays f32.
    fn_bf16 = jax.jit(functools.partial(
        vit_input_layer, num_patch_row=num_patch_row, matmul_dtype=jnp.bfloat16))
    z0_bf16 = fn_bf16(x, conv_w, conv_b, cls_token, pos_emb)
    jax.block_until_ready(z0_bf16)
    assert jnp.allclose(z0_bf16, ref, atol=3e-2, rtol=3e-2)

    # Multi-step grid with a ragged last block + bf16 output writeback
    # (exercises masked batch-tile writes and the out_dtype path).
    B2 = 5
    x2 = jax.random.normal(kx, (B2, C, H, H), dtype=jnp.float32)
    ref2 = _reference(x2, conv_w, conv_b, cls_token, pos_emb, num_patch_row)
    fn_small = jax.jit(functools.partial(
        vit_input_layer, num_patch_row=num_patch_row,
        matmul_dtype=jnp.bfloat16, out_dtype=jnp.bfloat16, target_rows=8))
    z2 = fn_small(x2, conv_w, conv_b, cls_token, pos_emb)
    jax.block_until_ready(z2)
    assert z2.shape == (B2, num_patch + 1, emb_dim)
    assert jnp.allclose(z2.astype(jnp.float32), ref2, atol=5e-2, rtol=5e-2)

    print("KERNEL_OK")
</pallas_src>

<mosaic_0001>
module attributes {stable_mosaic.version = 11 : i64} {
  func.func @_vit_input_kernel(%arg0: i32, %arg1: memref<2x4x256xf32, #tpu.memory_space<vmem>>, %arg2: memref<256x128xf32, #tpu.memory_space<vmem>>, %arg3: memref<4x128xf32, #tpu.memory_space<vmem>>, %arg4: memref<1x128xf32, #tpu.memory_space<vmem>>, %arg5: memref<2x5x128xf32, #tpu.memory_space<vmem>>) attributes {dimension_semantics = [#tpu.dimension_semantics<parallel>], iteration_bounds = array<i64: 1>, scalar_prefetch = 0 : i64, scratch_operands = 0 : i64, tpu.core_type = #tpu.core_type<tc>, window_params = [{transform_indices = @transform_0, window_bounds = array<i64: 2, 4, 256>}, {pipeline_mode = #tpu.pipeline_mode<synchronous>, transform_indices = @transform_1, window_bounds = array<i64: 256, 128>}, {pipeline_mode = #tpu.pipeline_mode<synchronous>, transform_indices = @transform_2, window_bounds = array<i64: 4, 128>}, {pipeline_mode = #tpu.pipeline_mode<synchronous>, transform_indices = @transform_3, window_bounds = array<i64: 1, 128>}, {transform_indices = @transform_4, window_bounds = array<i64: 2, 5, 128>}]} {
    %c0 = arith.constant 0 : index
    %c0_0 = arith.constant 0 : index
    %0 = vector.load %arg2[%c0, %c0_0] : memref<256x128xf32, #tpu.memory_space<vmem>>, vector<256x128xf32>
    %c0_1 = arith.constant 0 : index
    %c0_2 = arith.constant 0 : index
    %1 = vector.load %arg3[%c0_1, %c0_2] : memref<4x128xf32, #tpu.memory_space<vmem>>, vector<4x128xf32>
    %c0_3 = arith.constant 0 : index
    %c0_4 = arith.constant 0 : index
    %2 = vector.load %arg4[%c0_3, %c0_4] : memref<1x128xf32, #tpu.memory_space<vmem>>, vector<1x128xf32>
    %c0_5 = arith.constant 0 : index
    %c0_6 = arith.constant 0 : index
    %c0_7 = arith.constant 0 : index
    %3 = vector.load %arg1[%c0_5, %c0_6, %c0_7] : memref<2x4x256xf32, #tpu.memory_space<vmem>>, vector<1x4x256xf32>
    %4 = vector.shape_cast %3 : vector<1x4x256xf32> to vector<4x256xf32>
    %cst = arith.constant dense<0.000000e+00> : vector<4x128xf32>
    %5 = tpu.matmul %4, %0, %cst {dimension_numbers = #tpu.dot_dimension_numbers<[1], [0], [0], [1], [0, 0, 1, 1], [], []>} : vector<4x256xf32>, vector<256x128xf32>, vector<4x128xf32> -> vector<4x128xf32>
    %c0_8 = arith.constant 0 : index
    %c0_9 = arith.constant 0 : index
    %c0_10 = arith.constant 0 : index
    %6 = vector.load %arg5[%c0_8, %c0_9, %c0_10] : memref<2x5x128xf32, #tpu.memory_space<vmem>>, vector<1x1x128xf32>
    %7 = vector.shape_cast %6 : vector<1x1x128xf32> to vector<1x128xf32>
    %8 = vector.shape_cast %2 : vector<1x128xf32> to vector<1x1x128xf32>
    tpu.vector_store %arg5[%c0_8, %c0_9, %c0_10], %8 {strides = array<i32>} : memref<2x5x128xf32, #tpu.memory_space<vmem>>, vector<1x1x128xf32>,
    %9 = arith.addf %5, %1 : vector<4x128xf32>
    %c0_11 = arith.constant 0 : index
    %c1 = arith.constant 1 : index
    %c0_12 = arith.constant 0 : index
    %10 = vector.load %arg5[%c0_11, %c1, %c0_12] : memref<2x5x128xf32, #tpu.memory_space<vmem>>, vector<1x4x128xf32>
    %11 = vector.shape_cast %10 : vector<1x4x128xf32> to vector<4x128xf32>
    %12 = vector.shape_cast %9 : vector<4x128xf32> to vector<1x4x128xf32>
    tpu.vector_store %arg5[%c0_11, %c1, %c0_12], %12 {strides = array<i32>} : memref<2x5x128xf32, #tpu.memory_space<vmem>>, vector<1x4x128xf32>,
    %c1_13 = arith.constant 1 : index
    %c0_14 = arith.constant 0 : index
    %c0_15 = arith.constant 0 : index
    %13 = vector.load %arg1[%c1_13, %c0_14, %c0_15] : memref<2x4x256xf32, #tpu.memory_space<vmem>>, vector<1x4x256xf32>
    %14 = vector.shape_cast %13 : vector<1x4x256xf32> to vector<4x256xf32>
    %cst_16 = arith.constant dense<0.000000e+00> : vector<4x128xf32>
    %15 = tpu.matmul %14, %0, %cst_16 {dimension_numbers = #tpu.dot_dimension_numbers<[1], [0], [0], [1], [0, 0, 1, 1], [], []>} : vector<4x256xf32>, vector<256x128xf32>, vector<4x128xf32> -> vector<4x128xf32>
    %c1_17 = arith.constant 1 : index
    %c0_18 = arith.constant 0 : index
    %c0_19 = arith.constant 0 : index
    %16 = vector.load %arg5[%c1_17, %c0_18, %c0_19] : memref<2x5x128xf32, #tpu.memory_space<vmem>>, vector<1x1x128xf32>
    %17 = vector.shape_cast %16 : vector<1x1x128xf32> to vector<1x128xf32>
    %18 = vector.shape_cast %2 : vector<1x128xf32> to vector<1x1x128xf32>
    tpu.vector_store %arg5[%c1_17, %c0_18, %c0_19], %18 {strides = array<i32>} : memref<2x5x128xf32, #tpu.memory_space<vmem>>, vector<1x1x128xf32>,
    %19 = arith.addf %15, %1 : vector<4x128xf32>
    %c1_20 = arith.constant 1 : index
    %c1_21 = arith.constant 1 : index
    %c0_22 = arith.constant 0 : index
    %20 = vector.load %arg5[%c1_20, %c1_21, %c0_22] : memref<2x5x128xf32, #tpu.memory_space<vmem>>, vector<1x4x128xf32>
    %21 = vector.shape_cast %20 : vector<1x4x128xf32> to vector<4x128xf32>
    %22 = vector.shape_cast %19 : vector<4x128xf32> to vector<1x4x128xf32>
    tpu.vector_store %arg5[%c1_20, %c1_21, %c0_22], %22 {strides = array<i32>} : memref<2x5x128xf32, #tpu.memory_space<vmem>>, vector<1x4x128xf32>,
    return
  }
  func.func @transform_0(%arg0: i32) -> (i32, i32, i32) {
    %c0_i32 = arith.constant 0 : i32
    %c0_i32_0 = arith.constant 0 : i32
    %c0_i32_1 = arith.constant 0 : i32
    return %arg0, %c0_i32, %c0_i32_0 : i32, i32, i32
  }
  func.func @transform_1(%arg0: i32) -> (i32, i32) {
    %c0_i32 = arith.constant 0 : i32
    %c0_i32_0 = arith.constant 0 : i32
    %c0_i32_1 = arith.constant 0 : i32
    return %c0_i32, %c0_i32_0 : i32, i32
  }
  func.func @transform_2(%arg0: i32) -> (i32, i32) {
    %c0_i32 = arith.constant 0 : i32
    %c0_i32_0 = arith.constant 0 : i32
    %c0_i32_1 = arith.constant 0 : i32
    return %c0_i32, %c0_i32_0 : i32, i32
  }
  func.func @transform_3(%arg0: i32) -> (i32, i32) {
    %c0_i32 = arith.constant 0 : i32
    %c0_i32_0 = arith.constant 0 : i32
    %c0_i32_1 = arith.constant 0 : i32
    return %c0_i32, %c0_i32_0 : i32, i32
  }
  func.func @transform_4(%arg0: i32) -> (i32, i32, i32) {
    %c0_i32 = arith.constant 0 : i32
    %c0_i32_0 = arith.constant 0 : i32
    %c0_i32_1 = arith.constant 0 : i32
    return %arg0, %c0_i32, %c0_i32_0 : i32, i32, i32
  }
}

</mosaic_0001>

<bundles_post_ra>
// kernel: vit_input_layer.1
= control target key start
LH: loop header
LB: loop body
LE: loop exit
PB: predicated region body
PF: predicated region fallthrough
CT: control target
= control target key end

     0   :  { %s303_s1 = inlined_call_operand.vmem [shape: f32[256,128], index: 1, kind: input, shape index: {}]   ;;  %s304_s0 = inlined_call_operand.vmem [shape: f32[2,4,256], index: 0, kind: input, shape index: {}]   ;;  %s305_s3 = inlined_call_operand.vmem [shape: f32[1,128], index: 3, kind: input, shape index: {}]   ;;  %s306_s4 = inlined_call_operand.vmem [shape: f32[2,5,128], index: 4, kind: output, shape index: {}]   ;;  %s307_s2 = inlined_call_operand.vmem [shape: f32[4,128], index: 2, kind: input, shape index: {}]  }
   0x1   :  { %v32_v0 = vld [vmem:[%s303_s1 + $0x78] sm:$0xff]  ;;  %v31_v1 = vld [vmem:[%s303_s1 + $0x70] sm:$0xff]  ;;  %v30_v4 = vld [vmem:[%s303_s1 + $0x68] sm:$0xff] }
   0x2   :  { %v48_v2 = vld [vmem:[%s303_s1 + $0xf8] sm:$0xff]  ;;  %110 = vmatpush.msra.mxu2 %v32_v0  ;;  %v47_v3 = vld [vmem:[%s303_s1 + $0xf0] sm:$0xff]  ;;  %59 = vmatpush.msra.mxu0 %v32_v0  ;;  %v46_v5 = vld [vmem:[%s303_s1 + $0xe8] sm:$0xff] }
   0x3   :  { %130 = vmatpush.msra.mxu3 %v48_v2  ;;  %79 = vmatpush.msra.mxu1 %v48_v2  ;;  %v29_v6 = vld [vmem:[%s303_s1 + $0x60] sm:$0xff]  ;;  %v28_v8 = vld [vmem:[%s303_s1 + $0x58] sm:$0xff]  ;;  %v27_v10 = vld [vmem:[%s303_s1 + $0x50] sm:$0xff] }
   0x4   :  { %111 = vmatpush.msra.mxu2 %v31_v1  ;;  %60 = vmatpush.msra.mxu0 %v31_v1  ;;  %v45_v7 = vld [vmem:[%s303_s1 + $0xe0] sm:$0xff]  ;;  %v44_v9 = vld [vmem:[%s303_s1 + $0xd8] sm:$0xff]  ;;  %v43_v11 = vld [vmem:[%s303_s1 + $0xd0] sm:$0xff] }
   0x5   :  { %131 = vmatpush.msra.mxu3 %v47_v3  ;;  %80 = vmatpush.msra.mxu1 %v47_v3  ;;  %v26_v12 = vld [vmem:[%s303_s1 + $0x48] sm:$0xff]  ;;  %v51_v14 = vld [vmem:[%s304_s0] sm:$0xff]  ;;  %v24_v17 = vld [vmem:[%s303_s1 + $0x38] sm:$0xff] }
   0x6   :  { %112 = vmatpush.msra.mxu2 %v30_v4  ;;  %61 = vmatpush.msra.mxu0 %v30_v4  ;;  %v42_v13 = vld [vmem:[%s303_s1 + $0xc8] sm:$0xff]  ;;  %54 = vst [vmem:[#allocation1] ss:$2 sm:$0xff] %v51_v14  ;;  %v25_v15 = vld [vmem:[%s303_s1 + $0x40] sm:$0xff]  ;;  %v40_v18 = vld [vmem:[%s303_s1 + $0xb8] sm:$0xff] }
   0x7   :  { %132 = vmatpush.msra.mxu3 %v46_v5  ;;  %81 = vmatpush.msra.mxu1 %v46_v5  ;;  %v41_v16 = vld [vmem:[%s303_s1 + $0xc0] sm:$0xff]  ;;  %v23_v19 = vld [vmem:[%s303_s1 + $0x30] sm:$0xff]  ;;  %v155_v21 = vld [vmem:[%s304_s0 + $0x8] sm:$0xff] }
   0x8   :  { %113 = vmatpush.msra.mxu2 %v29_v6  ;;  %62 = vmatpush.msra.mxu0 %v29_v6  ;;  %v39_v20 = vld [vmem:[%s303_s1 + $0xb0] sm:$0xff]  ;;  %v22_v22 = vld [vmem:[%s303_s1 + $0x28] sm:$0xff]  ;;  %v21_v26 = vld [vmem:[%s303_s1 + $0x20] sm:$0xff] }
   0x9   :  { %133 = vmatpush.msra.mxu3 %v45_v7  ;;  %82 = vmatpush.msra.mxu1 %v45_v7  ;;  %v38_v23 = vld [vmem:[%s303_s1 + $0xa8] sm:$0xff]  ;;  %v37_v27 = vld [vmem:[%s303_s1 + $0xa0] sm:$0xff]  ;;  %v20_v28 = vld [vmem:[%s303_s1 + $0x18] sm:$0xff] }
   0xa   :  { %114 = vmatpush.msra.mxu2 %v28_v8  ;;  %63 = vmatpush.msra.mxu0 %v28_v8  ;;  %v36_v29 = vld [vmem:[%s303_s1 + $0x98] sm:$0xff]  ;;  %v19_v30 = vld [vmem:[%s303_s1 + $0x10] sm:$0xff]  ;;  %v18_v32 = vld [vmem:[%s303_s1 + $0x8] sm:$0xff] }
   0xb   :  { %134 = vmatpush.msra.mxu3 %v44_v9  ;;  %83 = vmatpush.msra.mxu1 %v44_v9  ;;  %v35_v31 = vld [vmem:[%s303_s1 + $0x90] sm:$0xff]  ;;  %v34_v33 = vld [vmem:[%s303_s1 + $0x88] sm:$0xff]  ;;  %v17_v34 = vld [vmem:[%s303_s1] sm:$0xff] }
   0xc   :  { %115 = vmatpush.msra.mxu2 %v27_v10  ;;  %64 = vmatpush.msra.mxu0 %v27_v10  ;;  %v33_v35 = vld [vmem:[%s303_s1 + $0x80] sm:$0xff] }
   0xd   :  { %135 = vmatpush.msra.mxu3 %v43_v11  ;;  %84 = vmatpush.msra.mxu1 %v43_v11  ;;  %v55_v24 = vld.sshfl [vmem:[#allocation1] sm:$0xff pattern:$0x75316420]  ;;  %v56_v25 = vld.sshfl [vmem:[#allocation1 + $0x8] sm:$0xff pattern:$0x75316420] }
   0xe   :  { %116 = vmatpush.msra.mxu2 %v26_v12  ;;  %65 = vmatpush.msra.mxu0 %v26_v12  ;;  %105 = vst [vmem:[#allocation1] ss:$2 sm:$0xff] %v155_v21  ;;  %v50_v38 = vld [vmem:[%s305_s3] sm:$0x1] }
   0xf   :  { %136 = vmatpush.msra.mxu3 %v42_v13  ;;  %85 = vmatpush.msra.mxu1 %v42_v13  ;;  %52 = vst [vmem:[%s306_s4] sm:$0x1] %v50_v38  ;;  %v49_v39 = vld [vmem:[%s307_s2] sm:$0xf] }
  0x10   :  { %117 = vmatpush.msra.mxu2 %v25_v15  ;;  %66 = vmatpush.msra.mxu0 %v25_v15  ;;  %156 = vst [vmem:[%s306_s4 + $0x8] sm:$0x1] %v50_v38 }
  0x11   :  { %137 = vmatpush.msra.mxu3 %v41_v16  ;;  %86 = vmatpush.msra.mxu1 %v41_v16 }
  0x12   :  { %118 = vmatpush.msra.mxu2 %v24_v17  ;;  %67 = vmatpush.msra.mxu0 %v24_v17 }
  0x13   :  { %138 = vmatpush.msra.mxu3 %v40_v18  ;;  %87 = vmatpush.msra.mxu1 %v40_v18 }
  0x14   :  { %119 = vmatpush.msra.mxu2 %v23_v19  ;;  %68 = vmatpush.msra.mxu0 %v23_v19 }
  0x15   :  { %139 = vmatpush.msra.mxu3 %v39_v20  ;;  %88 = vmatpush.msra.mxu1 %v39_v20  ;;  %v106_v36 = vld.sshfl [vmem:[#allocation1] sm:$0xff pattern:$0x75316420]  ;;  %v107_v37 = vld.sshfl [vmem:[#allocation1 + $0x8] sm:$0xff pattern:$0x75316420] }
  0x16   :  { %120 = vmatpush.msra.mxu2 %v22_v22  ;;  %69 = vmatpush.msra.mxu0 %v22_v22 }
  0x17   :  { %140 = vmatpush.msra.mxu3 %v38_v23  ;;  %89 = vmatpush.msra.mxu1 %v38_v23 }
  0x18   :  { %121 = vmatpush.msra.mxu2 %v21_v26  ;;  %70 = vmatpush.msra.mxu0 %v21_v26 }
  0x19   :  { %141 = vmatpush.msra.mxu3 %v37_v27  ;;  %90 = vmatpush.msra.mxu1 %v37_v27 }
  0x1a   :  { %122 = vmatpush.msra.mxu2 %v20_v28  ;;  %71 = vmatpush.msra.mxu0 %v20_v28 }
  0x1b   :  { %142 = vmatpush.msra.mxu3 %v36_v29  ;;  %91 = vmatpush.msra.mxu1 %v36_v29 }
  0x1c   :  { %123 = vmatpush.msra.mxu2 %v19_v30  ;;  %72 = vmatpush.msra.mxu0 %v19_v30 }
  0x1d   :  { %143 = vmatpush.msra.mxu3 %v35_v31  ;;  %92 = vmatpush.msra.mxu1 %v35_v31 }
  0x1e   :  { %124 = vmatpush.msra.mxu2 %v18_v32  ;;  %73 = vmatpush.msra.mxu0 %v18_v32 }
  0x1f   :  { %144 = vmatpush.msra.mxu3 %v34_v33  ;;  %93 = vmatpush.msra.mxu1 %v34_v33 }
  0x20   :  { %125 = vmatpush.msra.mxu2 %v17_v34  ;;  %74 = vmatpush.msra.mxu0 %v17_v34 }
  0x21   :  { %145 = vmatpush.msra.mxu3 %v33_v35  ;;  %126 = vmatmul.f32.vlgmr.msra.gmra.mxu2 %v106_v36 }
  0x22   :  { %146 = vmatmul.f32.vlgmr.msra.gmra.mxu3 %v107_v37  ;;  %94 = vmatpush.msra.mxu1 %v33_v35 }
  0x23   :  { %75 = vmatmul.f32.vlgmr.msra.gmra.mxu0 %v55_v24  ;;  %95 = vmatmul.f32.vlgmr.msra.gmra.mxu1 %v56_v25 }
  0xa0   :  { %v76_v40 = vpop.f32.mrf.mxu0  ;;  %v96_v41 = vpop.f32.mrf.mxu1 }
  0xa1   :  { %v77_v42 = vadd.f32 %v76_v40, %v49_v39 }
  0xa3   :  { %v97_v43 = vadd.f32 %v96_v41, %v77_v42 }
  0xa4   :  { %v127_v44 = vpop.f32.mrf.mxu2 }
  0xa5   :  { %v147_v45 = vpop.f32.mrf.mxu3  ;;  %v128_v46 = vadd.f32 %v127_v44, %v49_v39  ;;  %99 = vst [vmem:[%s306_s4 + $0x1] sm:$0xf] %v97_v43 }
  0xa7   :  { %v148_v47 = vadd.f32 %v147_v45, %v128_v46 }
  0xa9   :  { %157 = vst [vmem:[%s306_s4 + $0x9] sm:$0xf] %v148_v47 }

</bundles_post_ra>
